<compile_context>
chip_gen: v6e
topology: v6e:2x2x1
jax: 0.10.0
libtpu: 0.0.40
codegen_flags: <defaults>
</compile_context>

<pallas_src>
import jax
import jax.numpy as jnp
import numpy as np
from jax.experimental import pallas as pl
from jax.experimental.pallas import tpu as pltpu


def expert_kernel(x_ref, w1_ref, b1_ref, w2_ref, b2_ref, w3_ref, b3_ref, o_ref):
    """Fused 3-layer MLP (bf16 MXU inputs, f32 accumulation / bias / ReLU)."""
    x = x_ref[...]                                               # (tb, in_dim) bf16
    h1 = jnp.dot(x, w1_ref[...], preferred_element_type=jnp.float32) + b1_ref[...]
    h1 = jnp.maximum(h1, 0.0)                                    # ReLU (+ eval Dropout = id)
    h2 = jnp.dot(h1.astype(jnp.bfloat16), w2_ref[...],
                 preferred_element_type=jnp.float32) + b2_ref[...]
    h2 = jnp.maximum(h2, 0.0)                                    # ReLU (+ eval Dropout = id)
    h3 = jnp.dot(h2.astype(jnp.bfloat16), w3_ref[...],
                 preferred_element_type=jnp.float32) + b3_ref[...]
    o_ref[...] = jnp.maximum(h3, 0.0).astype(o_ref.dtype)        # final ReLU (+ Dropout = id)


# Large, sublane-aligned batch tile (multiple of 8). Per-step overhead ~0.35 us
# amortizes well past ~512 rows; 4096 keeps tiles < 0.5 MiB each even double-
# buffered, so it is safe for v7x's smaller VMEM as well.
TILE_B = 4096


def expert_forward(x, params, tile_b=TILE_B, out_dtype=jnp.float32):
    """x: (B, input_dim) float32. params: dict of w1,b1,w2,b2,w3,b3 (f32)."""
    w1, b1, w2, b2, w3, b3 = (params["w1"], params["b1"], params["w2"],
                              params["b2"], params["w3"], params["b3"])
    B, in_dim = x.shape
    out_dim = w3.shape[1]

    # bf16 MXU operands; casting x here (not in-kernel) halves its HBM traffic.
    x_bf = x.astype(jnp.bfloat16)
    w1_bf = w1.astype(jnp.bfloat16)
    w2_bf = w2.astype(jnp.bfloat16)
    w3_bf = w3.astype(jnp.bfloat16)

    # Effective tile: multiple of 8, no larger than the 8-aligned batch.
    b_aligned = ((B + 7) // 8) * 8
    tb = max(8, (min(tile_b, b_aligned) // 8) * 8)
    Bp = ((B + tb - 1) // tb) * tb
    if Bp != B:
        x_bf = jnp.pad(x_bf, ((0, Bp - B), (0, 0)))

    grid = (Bp // tb,)

    def row_spec(dim):                       # tiled along batch (pipelined)
        return pl.BlockSpec((tb, dim), lambda i: (i, 0))

    def resident_spec(shape):                # VMEM-resident across the grid
        return pl.BlockSpec(shape, lambda i: (0, 0))

    out_itemsize = np.dtype(out_dtype).itemsize
    weight_bytes = sum(int(a.size) * a.dtype.itemsize
                       for a in (w1_bf, b1, w2_bf, b2, w3_bf, b3))
    cost = pl.CostEstimate(
        flops=2 * Bp * (in_dim * 64 + 64 * 32 + 32 * out_dim),
        transcendentals=0,
        bytes_accessed=Bp * in_dim * 2 + Bp * out_dim * out_itemsize + weight_bytes,
    )

    out = pl.pallas_call(
        expert_kernel,
        out_shape=jax.ShapeDtypeStruct((Bp, out_dim), out_dtype),
        grid=grid,
        in_specs=[
            row_spec(in_dim),
            resident_spec(w1_bf.shape), resident_spec(b1.shape),
            resident_spec(w2_bf.shape), resident_spec(b2.shape),
            resident_spec(w3_bf.shape), resident_spec(b3.shape),
        ],
        out_specs=row_spec(out_dim),
        compiler_params=pltpu.CompilerParams(
            dimension_semantics=("parallel",),   # shard batch across TCs on v7x
        ),
        cost_estimate=cost,
    )(x_bf, w1_bf, b1, w2_bf, b2, w3_bf, b3)

    return out[:B]


def init_expert_params(key, input_dim, output_dim):
    """Deterministic init mimicking PyTorch nn.Linear default (U[-1/sqrt(fan_in), +])."""
    hidden = [64, 32]
    dims = [input_dim] + hidden + [output_dim]
    params = {}
    for i, (din, dout) in enumerate(zip(dims[:-1], dims[1:]), start=1):
        key, kw, kb = jax.random.split(key, 3)
        bound = 1.0 / jnp.sqrt(jnp.float32(din))
        params[f"w{i}"] = jax.random.uniform(kw, (din, dout), jnp.float32, -bound, bound)
        params[f"b{i}"] = jax.random.uniform(kb, (1, dout), jnp.float32, -bound, bound)
    return params


def expert_reference_f32(x, params):
    """Pure-f32 JAX reference (module semantics, eval-mode dropout)."""
    h = jnp.maximum(x @ params["w1"] + params["b1"], 0.0)
    h = jnp.maximum(h @ params["w2"] + params["b2"], 0.0)
    return jnp.maximum(h @ params["w3"] + params["b3"], 0.0)


def expert_reference_bf16(x, params):
    """Reference that mirrors the kernel's bf16-operand / f32-accumulate math."""
    bf = jnp.bfloat16
    h = jnp.maximum(jnp.dot(x.astype(bf), params["w1"].astype(bf),
                            preferred_element_type=jnp.float32) + params["b1"], 0.0)
    h = jnp.maximum(jnp.dot(h.astype(bf), params["w2"].astype(bf),
                            preferred_element_type=jnp.float32) + params["b2"], 0.0)
    h = jnp.maximum(jnp.dot(h.astype(bf), params["w3"].astype(bf),
                            preferred_element_type=jnp.float32) + params["b3"], 0.0)
    return h


if __name__ == "__main__":
    input_dim = 32
    output_dim = 16
    batch = 8

    key = jax.random.PRNGKey(0)
    key, kx = jax.random.split(key)
    x = jax.random.normal(kx, (batch, input_dim), jnp.float32)
    params = init_expert_params(key, input_dim, output_dim)

    out = expert_forward(x, params)
    out = jax.block_until_ready(out)
    assert out.shape == (batch, output_dim)

    # Tight check vs a reference using the same bf16-operand math.
    ref_bf16 = expert_reference_bf16(x, params)
    assert jnp.allclose(out, ref_bf16, atol=2e-3, rtol=2e-3)

    # Loose sanity check vs the pure-f32 module semantics.
    ref_f32 = expert_reference_f32(x, params)
    assert jnp.allclose(out, ref_f32, atol=1e-1, rtol=1e-1)

    print("KERNEL_OK")
</pallas_src>

<mosaic_0001>
module attributes {stable_mosaic.version = 11 : i64} {
  func.func @expert_kernel(%arg0: i32, %arg1: memref<8x32xbf16, #tpu.memory_space<vmem>>, %arg2: memref<32x64xbf16, #tpu.memory_space<vmem>>, %arg3: memref<1x64xf32, #tpu.memory_space<vmem>>, %arg4: memref<64x32xbf16, #tpu.memory_space<vmem>>, %arg5: memref<1x32xf32, #tpu.memory_space<vmem>>, %arg6: memref<32x16xbf16, #tpu.memory_space<vmem>>, %arg7: memref<1x16xf32, #tpu.memory_space<vmem>>, %arg8: memref<8x16xf32, #tpu.memory_space<vmem>>) attributes {dimension_semantics = [#tpu.dimension_semantics<parallel>], iteration_bounds = array<i64: 1>, scalar_prefetch = 0 : i64, scratch_operands = 0 : i64, tpu.core_type = #tpu.core_type<tc>, window_params = [{transform_indices = @transform_0, window_bounds = array<i64: 8, 32>}, {pipeline_mode = #tpu.pipeline_mode<synchronous>, transform_indices = @transform_1, window_bounds = array<i64: 32, 64>}, {pipeline_mode = #tpu.pipeline_mode<synchronous>, transform_indices = @transform_2, window_bounds = array<i64: 1, 64>}, {pipeline_mode = #tpu.pipeline_mode<synchronous>, transform_indices = @transform_3, window_bounds = array<i64: 64, 32>}, {pipeline_mode = #tpu.pipeline_mode<synchronous>, transform_indices = @transform_4, window_bounds = array<i64: 1, 32>}, {pipeline_mode = #tpu.pipeline_mode<synchronous>, transform_indices = @transform_5, window_bounds = array<i64: 32, 16>}, {pipeline_mode = #tpu.pipeline_mode<synchronous>, transform_indices = @transform_6, window_bounds = array<i64: 1, 16>}, {transform_indices = @transform_7, window_bounds = array<i64: 8, 16>}]} {
    %c0 = arith.constant 0 : index
    %c0_0 = arith.constant 0 : index
    %0 = vector.load %arg1[%c0, %c0_0] : memref<8x32xbf16, #tpu.memory_space<vmem>>, vector<8x32xbf16>
    %c0_1 = arith.constant 0 : index
    %c0_2 = arith.constant 0 : index
    %1 = vector.load %arg2[%c0_1, %c0_2] : memref<32x64xbf16, #tpu.memory_space<vmem>>, vector<32x64xbf16>
    %cst = arith.constant dense<0.000000e+00> : vector<8x64xf32>
    %2 = tpu.matmul %0, %1, %cst {dimension_numbers = #tpu.dot_dimension_numbers<[1], [0], [0], [1], [0, 0, 1, 1], [], []>} : vector<8x32xbf16>, vector<32x64xbf16>, vector<8x64xf32> -> vector<8x64xf32>
    %c0_3 = arith.constant 0 : index
    %c0_4 = arith.constant 0 : index
    %3 = vector.load %arg3[%c0_3, %c0_4] : memref<1x64xf32, #tpu.memory_space<vmem>>, vector<1x64xf32>
    %4 = vector.broadcast %3 : vector<1x64xf32> to vector<8x64xf32>
    %5 = arith.addf %2, %4 : vector<8x64xf32>
    %cst_5 = arith.constant 0.000000e+00 : f32
    %6 = vector.broadcast %cst_5 : f32 to vector<8x64xf32>
    %7 = arith.maximumf %5, %6 : vector<8x64xf32>
    %8 = arith.truncf %7 : vector<8x64xf32> to vector<8x64xbf16>
    %c0_6 = arith.constant 0 : index
    %c0_7 = arith.constant 0 : index
    %9 = vector.load %arg4[%c0_6, %c0_7] : memref<64x32xbf16, #tpu.memory_space<vmem>>, vector<64x32xbf16>
    %cst_8 = arith.constant dense<0.000000e+00> : vector<8x32xf32>
    %10 = tpu.matmul %8, %9, %cst_8 {dimension_numbers = #tpu.dot_dimension_numbers<[1], [0], [0], [1], [0, 0, 1, 1], [], []>} : vector<8x64xbf16>, vector<64x32xbf16>, vector<8x32xf32> -> vector<8x32xf32>
    %c0_9 = arith.constant 0 : index
    %c0_10 = arith.constant 0 : index
    %11 = vector.load %arg5[%c0_9, %c0_10] : memref<1x32xf32, #tpu.memory_space<vmem>>, vector<1x32xf32>
    %12 = vector.broadcast %11 : vector<1x32xf32> to vector<8x32xf32>
    %13 = arith.addf %10, %12 : vector<8x32xf32>
    %cst_11 = arith.constant 0.000000e+00 : f32
    %14 = vector.broadcast %cst_11 : f32 to vector<8x32xf32>
    %15 = arith.maximumf %13, %14 : vector<8x32xf32>
    %16 = arith.truncf %15 : vector<8x32xf32> to vector<8x32xbf16>
    %c0_12 = arith.constant 0 : index
    %c0_13 = arith.constant 0 : index
    %17 = vector.load %arg6[%c0_12, %c0_13] : memref<32x16xbf16, #tpu.memory_space<vmem>>, vector<32x16xbf16>
    %cst_14 = arith.constant dense<0.000000e+00> : vector<8x16xf32>
    %18 = tpu.matmul %16, %17, %cst_14 {dimension_numbers = #tpu.dot_dimension_numbers<[1], [0], [0], [1], [0, 0, 1, 1], [], []>} : vector<8x32xbf16>, vector<32x16xbf16>, vector<8x16xf32> -> vector<8x16xf32>
    %c0_15 = arith.constant 0 : index
    %c0_16 = arith.constant 0 : index
    %19 = vector.load %arg7[%c0_15, %c0_16] : memref<1x16xf32, #tpu.memory_space<vmem>>, vector<1x16xf32>
    %20 = vector.broadcast %19 : vector<1x16xf32> to vector<8x16xf32>
    %21 = arith.addf %18, %20 : vector<8x16xf32>
    %cst_17 = arith.constant 0.000000e+00 : f32
    %22 = vector.broadcast %cst_17 : f32 to vector<8x16xf32>
    %23 = arith.maximumf %21, %22 : vector<8x16xf32>
    %c0_18 = arith.constant 0 : index
    %c0_19 = arith.constant 0 : index
    %24 = vector.load %arg8[%c0_18, %c0_19] : memref<8x16xf32, #tpu.memory_space<vmem>>, vector<8x16xf32>
    tpu.vector_store %arg8[%c0_18, %c0_19], %23 {strides = array<i32>} : memref<8x16xf32, #tpu.memory_space<vmem>>, vector<8x16xf32>,
    return
  }
  func.func @transform_0(%arg0: i32) -> (i32, i32) {
    %c0_i32 = arith.constant 0 : i32
    %c0_i32_0 = arith.constant 0 : i32
    return %arg0, %c0_i32 : i32, i32
  }
  func.func @transform_1(%arg0: i32) -> (i32, i32) {
    %c0_i32 = arith.constant 0 : i32
    %c0_i32_0 = arith.constant 0 : i32
    %c0_i32_1 = arith.constant 0 : i32
    return %c0_i32, %c0_i32_0 : i32, i32
  }
  func.func @transform_2(%arg0: i32) -> (i32, i32) {
    %c0_i32 = arith.constant 0 : i32
    %c0_i32_0 = arith.constant 0 : i32
    %c0_i32_1 = arith.constant 0 : i32
    return %c0_i32, %c0_i32_0 : i32, i32
  }
  func.func @transform_3(%arg0: i32) -> (i32, i32) {
    %c0_i32 = arith.constant 0 : i32
    %c0_i32_0 = arith.constant 0 : i32
    %c0_i32_1 = arith.constant 0 : i32
    return %c0_i32, %c0_i32_0 : i32, i32
  }
  func.func @transform_4(%arg0: i32) -> (i32, i32) {
    %c0_i32 = arith.constant 0 : i32
    %c0_i32_0 = arith.constant 0 : i32
    %c0_i32_1 = arith.constant 0 : i32
    return %c0_i32, %c0_i32_0 : i32, i32
  }
  func.func @transform_5(%arg0: i32) -> (i32, i32) {
    %c0_i32 = arith.constant 0 : i32
    %c0_i32_0 = arith.constant 0 : i32
    %c0_i32_1 = arith.constant 0 : i32
    return %c0_i32, %c0_i32_0 : i32, i32
  }
  func.func @transform_6(%arg0: i32) -> (i32, i32) {
    %c0_i32 = arith.constant 0 : i32
    %c0_i32_0 = arith.constant 0 : i32
    %c0_i32_1 = arith.constant 0 : i32
    return %c0_i32, %c0_i32_0 : i32, i32
  }
  func.func @transform_7(%arg0: i32) -> (i32, i32) {
    %c0_i32 = arith.constant 0 : i32
    %c0_i32_0 = arith.constant 0 : i32
    return %arg0, %c0_i32 : i32, i32
  }
}

</mosaic_0001>

<bundles_post_ra>
// kernel: tpu_custom_call.1
= control target key start
LH: loop header
LB: loop body
LE: loop exit
PB: predicated region body
PF: predicated region fallthrough
CT: control target
= control target key end

     0   :  { %v352_v1 = vmov 0.0   ;;  %vm353_vm0 = vmmov 0   ;;  %vm52_vm1 = vcmask 261120   ;;  %s439_s0 = inlined_call_operand.vmem [shape: bf16[8,32], index: 0, kind: input, shape index: {}]   ;;  %s440_s1 = inlined_call_operand.vmem [shape: bf16[32,64], index: 1, kind: input, shape index: {}]   ;;  %s441_s2 = inlined_call_operand.vmem [shape: f32[1,64], index: 2, kind: input, shape index: {}]   ;;  %s442_s3 = inlined_call_operand.vmem [shape: bf16[64,32], index: 3, kind: input, shape index: {}]   ;;  %s443_s4 = inlined_call_operand.vmem [shape: f32[1,32], index: 4, kind: input, shape index: {}]   ;;  %s444_s5 = inlined_call_operand.vmem [shape: bf16[32,16], index: 5, kind: input, shape index: {}]   ;;  %s445_s6 = inlined_call_operand.vmem [shape: f32[1,16], index: 6, kind: input, shape index: {}]   ;;  %s446_s7 = inlined_call_operand.hbm [shape: f32[8,16], index: 7, kind: output, shape index: {}]  }
   0x1   :  { %v322_v0 = vld [vmem:[%s440_s1 + $0x8] sm:$0xff]   ;;  %291 = vmatprep.subr.bf16.mxu0 %v352_v1  ;;  %299 = vmatprep.subr.bf16.mxu1 %v352_v1  ;;  %v323_v2 = vld [vmem:[%s440_s1] sm:$0xff]   ;;  %v324_v3 = vld [vmem:[%s442_s3 + $0x18] sm:$0xff]  }
   0x2   :  { %292 = vmatpush3.bf16.msra.mxu0 %v322_v0  ;;  %295 = vmatprep.mubr.msk.bf16.mxu0 %vm353_vm0, %v352_v1  ;;  %v28_v4 = vld [vmem:[%s439_s0] sm:$0xf]  ;;  %v325_v5 = vld [vmem:[%s442_s3 + $0x10] sm:$0xff]  }
   0x3   :  { %293 = vmatprep.subr.bf16.mxu0 %v352_v1  ;;  %307 = vmatprep.mubr.msk.bf16.mxu1 %vm353_vm0, %v352_v1 }
   0x4   :  { %300 = vmatpush3.bf16.msra.mxu1 %v324_v3 }
   0x5   :  { %301 = vmatprep.subr.bf16.mxu1 %v352_v1 }
   0x6   :  { %294 = vmatpush3.bf16.msra.mxu0 %v323_v2 }
   0x7   :  { %311 = vmatprep.subr.bf16.mxu0 %v352_v1 }
   0x8   :  { %12 = vsyncpa [#allocation3], 0  ;;  %302 = vmatpush3.bf16.msra.mxu1 %v325_v5  ;;  %v326_v6 = vld [vmem:[%s442_s3 + $0x8] sm:$0xff]   ;;  %v327_v7 = vld [vmem:[%s442_s3] sm:$0xff]   ;;  %vm137_vm2 = vcmask 523264   ;;  %vm250_vm3 = vcmask 130048  }
   0x9   :  { %296 = vmatmul.mubr.msk.bf16.vlgmr.msra.gmra.mxu0 %vm52_vm1, %v28_v4  ;;  %303 = vmatprep.subr.bf16.mxu1 %v352_v1  ;;  %v328_v8 = vld [vmem:[%s444_s5 + $0x8] sm:$0xff]   ;;  %v266_v9 = vld [vmem:[%s441_s2] ss:$0 sm:$0xff] }
   0xa   :  { %315 = vmatprep.mubr.msk.bf16.mxu0 %vm353_vm0, %v352_v1  ;;  %312 = vmatpush3.bf16.msra.mxu0 %v328_v8  ;;  %v329_v17 = vld [vmem:[%s444_s5] sm:$0xff]   ;;  %s354_s5 = smov [#allocation2]  }
   0xb   :  { %313 = vmatprep.subr.bf16.mxu0 %v352_v1  ;;  %v270_v18 = vld [vmem:[%s443_s4] ss:$0 sm:$0xff]  ;;  %s258_s21 = sshll.u32 %s354_s5, 4  ;;  %s259_s21 = int_to_ptr.vmem [resolvable:$true] %s258_s21 }
   0xc   :  { %304 = vmatpush3.bf16.msra.mxu1 %v326_v6  ;;  %v276_v26 = vld [vmem:[%s445_s6] ss:$0 sm:$0xff]  ;;  %s330_s4 = scalar_lea.vmem %s259_s21, 128  ;;  %p335_p1 = scmp.lt.s32.totalorder %s259_s21, %s259_s21 }
   0xd   :  { %305 = vmatprep.subr.bf16.mxu1 %v352_v1  ;;  %p331_p0 = scmp.ne.s32.totalorder %s259_s21, %s330_s4  ;;  %p336_p2 = scmp.lt.s32.totalorder %s330_s4, %s330_s4 }
   0xe   :  { %314 = vmatpush3.bf16.msra.mxu0 %v329_v17 }
   0xf   :  { %p337_p3 = por %p336_p2, %p335_p1 }
  0x10   :  { %306 = vmatpush3.bf16.msra.mxu1 %v327_v7 }
  0x11   :  { %p338_p4 = pnand %p337_p3, %p331_p0 }
  0xc9   :  { %v90_v10 = vpop.f32.mrf.mxu0 }
  0xca   :  { %v91_v11 = vadd.f32 %v266_v9, %v90_v10 }
  0xcb   :  { %v297_v12 = vpop.f32.mrf.mxu0 }
  0xcc   :  { %v96_v13 = vmax.f32 %v91_v11, 0.0 }
  0xcd   :  { %v93_v14 = vpop.f32.mrf.mxu0 }
  0xce   :  { %v97_v15 = vpack.c.bf16 %v96_v13, %v96_v13 }
  0xcf   :  { %v298_v16 = vpop.f32.mrf.mxu0 }
  0xd0   :  { %308 = vmatmul.mubr.msk.bf16.vlgmr.msra.gmra.mxu1 %vm137_vm2, %v97_v15 }
 0x190   :  { %v175_v19 = vpop.f32.mrf.mxu1 }
 0x191   :  { %v176_v20 = vadd.f32 %v270_v18, %v175_v19 }
 0x192   :  { %v309_v21 = vpop.f32.mrf.mxu1 }
 0x193   :  { %v181_v22 = vmax.f32 %v176_v20, 0.0 }
 0x194   :  { %v178_v23 = vpop.f32.mrf.mxu1 }
 0x195   :  { %v182_v24 = vpack.c.bf16 %v181_v22, %v181_v22 }
 0x196   :  { %v310_v25 = vpop.f32.mrf.mxu1 }
 0x197   :  { %316 = vmatmul.mubr.msk.bf16.vlgmr.msra.gmra.mxu0 %vm52_vm1, %v182_v24 }
 0x257   :  { %v243_v27 = vpop.f32.mrf.mxu0 }
 0x258   :  { %v244_v28 = vadd.f32 %v276_v26, %v243_v27 }
 0x259   :  { %v317_v29 = vpop.f32.mrf.mxu0 }
 0x25a   :  { %v249_v30 = vmax.f32 %v244_v28, 0.0 }
 0x25b   :  { %v246_v31 = vpop.f32.mrf.mxu0 }
 0x25c   :  { %251 = vst.msk [vmem:[#allocation2] sm:$0xff] %vm250_vm3, %v249_v30 }
 0x25d   :  { %v318_v32 = vpop.f32.mrf.mxu0 }
 0x25e   :  { %341 = shalt.err (!%p338_p4)
}
 0x25f   :  { %261 = dma.vmem_to_hbm [thread:$0]  %s259_s21, 128, %s446_s7, [#allocation3]  }
 0x260   :  { %350 = dma.done.wait [#allocation3], 128  }
 0x261   :  { %351 = vsyncadd [#allocation3], 4294967168 }
 0x262   :  { %265 = vsyncpa [#allocation3], 1 }

</bundles_post_ra>
